<compile_context>
chip_gen: v6e
topology: v6e:2x2x1
jax: 0.10.0
libtpu: 0.0.40
codegen_flags: <defaults>
</compile_context>

<pallas_src>
import jax
import jax.numpy as jnp
from jax.experimental import pallas as pl
from jax.experimental.pallas import tpu as pltpu

_LANES = 128
_SUBLANES = 8
# 2048 rows * 128 lanes * 4 B = 1 MiB per f32 block; 2 inputs x 2 pipeline
# buffers = 4 MiB scoped VMEM (16 MiB default on v5e, 32 MiB on v6e/v7x).
# For 16-/8-bit inputs the row budget scales up so the byte footprint stays
# roughly constant.
_MAX_BLOCK_BYTES = 2048 * 4


def _round_up(x, m):
    return ((x + m - 1) // m) * m


def _make_ccc_kernel(block_rows, rows, steps_per_shard, needs_mask):
    """Builds the per-step accumulation kernel (all sizes are static)."""
    tile_path = (block_rows % _SUBLANES == 0)
    sub_tiles = max(1, block_rows // _SUBLANES)

    def kernel(t_ref, p_ref, acc_ref):
        c = pl.program_id(0)   # shard axis ("parallel", v7x megacore split)
        k = pl.program_id(1)   # reduction axis ("arbitrary")

        @pl.when(k == 0)
        def _():
            acc_ref[...] = jnp.zeros_like(acc_ref)

        t = t_ref[...].astype(jnp.float32)  # (block_rows, 128)
        p = p_ref[...].astype(jnp.float32)

        if needs_mask:
            # Rows at/after `valid` belong to a partial block (garbage from a
            # masked DMA) or to a fully-duplicated, clamped block -> zero them
            # BEFORE any products so garbage never reaches the accumulators.
            g = c * steps_per_shard + k           # global block index
            valid = rows - g * block_rows
            row_ids = jax.lax.broadcasted_iota(
                jnp.int32, (block_rows, _LANES), 0)
            keep = row_ids < valid
            t = jnp.where(keep, t, 0.0)
            p = jnp.where(keep, p, 0.0)

        if tile_path:
            # Full-tile accumulation: fold (block_rows,128) -> (8,128) with a
            # layout-preserving reshape + leading-axis sum, then one aligned
            # unmasked (8,128) add per statistic.
            def tile_sum(x):
                if sub_tiles == 1:
                    return x
                return x.reshape(sub_tiles, _SUBLANES, _LANES).sum(axis=0)

            acc_ref[0:8, :] += tile_sum(t)
            acc_ref[8:16, :] += tile_sum(p)
            acc_ref[16:24, :] += tile_sum(t * p)
            acc_ref[24:32, :] += tile_sum(t * t)
            acc_ref[32:40, :] += tile_sum(p * p)
        else:
            # Tiny-input fallback (block_rows == rows < 8): single grid step,
            # so the masked (1,128) sub-tile RMWs happen exactly once.
            acc_ref[0:1, :] += jnp.sum(t, axis=0, keepdims=True)
            acc_ref[8:9, :] += jnp.sum(p, axis=0, keepdims=True)
            acc_ref[16:17, :] += jnp.sum(t * p, axis=0, keepdims=True)
            acc_ref[24:25, :] += jnp.sum(t * t, axis=0, keepdims=True)
            acc_ref[32:33, :] += jnp.sum(p * p, axis=0, keepdims=True)

    return kernel


def ccc_loss(predictions, targets, *, block_rows=None, num_shards=1):
    """Pallas TPU implementation of CCCLoss.forward.

    Inputs: 1-D arrays of equal length.  `num_shards=2` splits the streaming
    reduction across the two TensorCores of a v7x megacore (harmless, merely
    sequential, on 1-TC v5e/v6e chips).
    """
    assert predictions.shape == targets.shape
    assert predictions.ndim == 1
    n = predictions.shape[0]

    itemsize = jnp.dtype(predictions.dtype).itemsize
    pack = {4: 8, 2: 16, 1: 32}.get(itemsize, 8)  # native sublane packing

    rem = n % _LANES

    def to_2d(x):
        # Copy-free reshape when n is lane-aligned; otherwise pad only the
        # ragged tail up to the next lane boundary (zeros contribute nothing
        # to any of the five sufficient statistics).
        if rem:
            x = jnp.pad(x, (0, _LANES - rem))
        return x.reshape(-1, _LANES)

    t2 = to_2d(targets)
    p2 = to_2d(predictions)
    rows = t2.shape[0]

    # Block-size selection: big blocks amortize per-step overhead; either the
    # block equals the full row extent (always a legal BlockSpec) or it is a
    # multiple of the dtype's sublane pack (8/16/32) and strictly < rows.
    if block_rows is None:
        block_rows = _MAX_BLOCK_BYTES // itemsize
    block_rows = max(1, int(block_rows))
    if block_rows >= rows:
        block_rows = rows
    else:
        block_rows = _round_up(block_rows, pack)
        if block_rows >= rows:
            block_rows = rows

    steps_total = pl.cdiv(rows, block_rows)
    num_shards = max(1, min(int(num_shards), steps_total))
    steps_per_shard = pl.cdiv(steps_total, num_shards)
    covered_rows = num_shards * steps_per_shard * block_rows
    needs_mask = covered_rows != rows
    clamp = num_shards * steps_per_shard != steps_total

    def in_index(c, k):
        g = c * steps_per_shard + k
        if clamp:
            # Never request an out-of-range block; the duplicated block's
            # contribution is zeroed by the in-kernel row mask.
            g = jnp.minimum(g, steps_total - 1)
        return (g, 0)

    kernel = _make_ccc_kernel(block_rows, rows, steps_per_shard, needs_mask)

    acc = pl.pallas_call(
        kernel,
        out_shape=jax.ShapeDtypeStruct((num_shards * 40, _LANES), jnp.float32),
        grid_spec=pltpu.PrefetchScalarGridSpec(
            num_scalar_prefetch=0,
            grid=(num_shards, steps_per_shard),
            in_specs=[
                pl.BlockSpec((block_rows, _LANES), in_index),
                pl.BlockSpec((block_rows, _LANES), in_index),
            ],
            # Per-shard accumulator: block index constant over the reduction
            # axis (stays VMEM-resident, one writeback), distinct per shard.
            out_specs=pl.BlockSpec((40, _LANES), lambda c, k: (c, 0)),
        ),
        compiler_params=pltpu.CompilerParams(
            dimension_semantics=("parallel", "arbitrary")),
    )(t2, p2)

    # Tiny finalize in JAX: fold shards / sublanes / lanes, then scalar math.
    sums = acc.reshape(num_shards, 5, _SUBLANES, _LANES).sum(axis=(0, 2, 3))
    sum_t, sum_p, sum_tp, sum_tt, sum_pp = (sums[i] for i in range(5))

    n_f = jnp.float32(n)
    mean_t = sum_t / n_f
    mean_p = sum_p / n_f
    # Unbiased (N-1) covariance / variance, matching torch.cov / torch.var.
    nm1 = n_f - 1.0
    cov = (sum_tp - n_f * mean_t * mean_p) / nm1
    var_t = (sum_tt - n_f * mean_t * mean_t) / nm1
    var_p = (sum_pp - n_f * mean_p * mean_p) / nm1

    numerator = 2.0 * cov
    denominator = var_t + var_p + (mean_t - mean_p) ** 2
    return 1.0 - numerator / (denominator + 1e-07)


def _ccc_loss_ref(predictions, targets):
    # Pure-JAX reference mirroring the PyTorch module exactly.
    p = predictions.astype(jnp.float32)
    t = targets.astype(jnp.float32)
    n = p.shape[0]
    mean_t = jnp.mean(t)
    mean_p = jnp.mean(p)
    cov = jnp.sum((t - mean_t) * (p - mean_p)) / (n - 1)
    var_t = jnp.sum((t - mean_t) ** 2) / (n - 1)
    var_p = jnp.sum((p - mean_p) ** 2) / (n - 1)
    return 1.0 - 2.0 * cov / (var_t + var_p + (mean_t - mean_p) ** 2 + 1e-07)


if __name__ == "__main__":
    ccc_jit = jax.jit(ccc_loss, static_argnames=("block_rows", "num_shards"))

    # Case 1: ragged length (not a multiple of 128) -> lane-tail pad, tiny
    # full-extent block, single-step reduction.
    kp, kt = jax.random.split(jax.random.PRNGKey(0))
    N = 250
    preds = jax.random.normal(kp, (N,), dtype=jnp.float32)
    tgts = 0.7 * preds + 0.3 * jax.random.normal(kt, (N,), dtype=jnp.float32)
    loss = jax.block_until_ready(ccc_jit(preds, tgts))
    ref = jax.block_until_ready(_ccc_loss_ref(preds, tgts))
    assert jnp.allclose(loss, ref, rtol=1e-5, atol=1e-5), (loss, ref)

    # Case 2: lane-aligned length -> copy-free reshape, no in-kernel masking.
    kp1, kt1 = jax.random.split(jax.random.PRNGKey(1))
    N1 = 1024
    p1 = jax.random.normal(kp1, (N1,), dtype=jnp.float32) + 1.5
    t1 = 0.6 * p1 + 0.4 * jax.random.normal(kt1, (N1,), dtype=jnp.float32)
    loss1 = jax.block_until_ready(ccc_jit(p1, t1))
    ref1 = jax.block_until_ready(_ccc_loss_ref(p1, t1))
    assert jnp.allclose(loss1, ref1, rtol=1e-4, atol=1e-4), (loss1, ref1)

    # Case 3: small blocks + 2-way shard split (multi-step reduction,
    # per-shard accumulators, clamped duplicate block masked out).
    kp2, kt2 = jax.random.split(jax.random.PRNGKey(2))
    N2 = 3000
    p2 = jax.random.normal(kp2, (N2,), dtype=jnp.float32) + 2.0
    t2 = 0.5 * p2 + 0.5 * jax.random.normal(kt2, (N2,), dtype=jnp.float32)
    loss2 = jax.block_until_ready(ccc_jit(p2, t2, block_rows=8, num_shards=2))
    ref2 = jax.block_until_ready(_ccc_loss_ref(p2, t2))
    assert jnp.allclose(loss2, ref2, rtol=1e-4, atol=1e-4), (loss2, ref2)

    # Case 4: partial last block (rows not a multiple of block_rows) -> the
    # in-kernel row mask zeroes the garbage tail of the final DMA'd block.
    kp3, kt3 = jax.random.split(jax.random.PRNGKey(3))
    N3 = 2560  # 20 rows of 128; block_rows=8 -> 3 steps, last block partial
    p3 = jax.random.normal(kp3, (N3,), dtype=jnp.float32) - 1.0
    t3 = 0.8 * p3 + 0.2 * jax.random.normal(kt3, (N3,), dtype=jnp.float32)
    loss3 = jax.block_until_ready(ccc_jit(p3, t3, block_rows=8))
    ref3 = jax.block_until_ready(_ccc_loss_ref(p3, t3))
    assert jnp.allclose(loss3, ref3, rtol=1e-4, atol=1e-4), (loss3, ref3)

    print("KERNEL_OK")
</pallas_src>

<mosaic_0001>
module attributes {stable_mosaic.version = 11 : i64} {
  func.func @kernel(%arg0: i32, %arg1: i32, %arg2: memref<2x128xf32, #tpu.memory_space<vmem>>, %arg3: memref<2x128xf32, #tpu.memory_space<vmem>>, %arg4: memref<40x128xf32, #tpu.memory_space<vmem>>) attributes {dimension_semantics = [#tpu.dimension_semantics<parallel>, #tpu.dimension_semantics<arbitrary>], iteration_bounds = array<i64: 1, 1>, scalar_prefetch = 0 : i64, scratch_operands = 0 : i64, tpu.core_type = #tpu.core_type<tc>, window_params = [{transform_indices = @transform_0, window_bounds = array<i64: 2, 128>}, {transform_indices = @transform_1, window_bounds = array<i64: 2, 128>}, {transform_indices = @transform_2, window_bounds = array<i64: 40, 128>}]} {
    %c0_i32 = arith.constant 0 : i32
    %0 = arith.cmpi eq, %arg1, %c0_i32 : i32
    %1 = arith.extui %0 : i1 to i32
    %c0_i32_0 = arith.constant 0 : i32
    %2 = arith.cmpi ne, %1, %c0_i32_0 : i32
    scf.if %2 {
      %cst_24 = arith.constant 0.000000e+00 : f32
      %33 = vector.broadcast %cst_24 : f32 to vector<40x128xf32>
      %c0_25 = arith.constant 0 : index
      %c0_26 = arith.constant 0 : index
      %34 = vector.load %arg4[%c0_25, %c0_26] : memref<40x128xf32, #tpu.memory_space<vmem>>, vector<40x128xf32>
      tpu.vector_store %arg4[%c0_25, %c0_26], %33 {strides = array<i32>} : memref<40x128xf32, #tpu.memory_space<vmem>>, vector<40x128xf32>,
    } else {
    }
    %c0 = arith.constant 0 : index
    %c0_1 = arith.constant 0 : index
    %3 = vector.load %arg2[%c0, %c0_1] : memref<2x128xf32, #tpu.memory_space<vmem>>, vector<2x128xf32>
    %c0_2 = arith.constant 0 : index
    %c0_3 = arith.constant 0 : index
    %4 = vector.load %arg3[%c0_2, %c0_3] : memref<2x128xf32, #tpu.memory_space<vmem>>, vector<2x128xf32>
    %c0_4 = arith.constant 0 : index
    %c0_5 = arith.constant 0 : index
    %5 = vector.load %arg4[%c0_4, %c0_5] : memref<40x128xf32, #tpu.memory_space<vmem>>, vector<1x128xf32>
    %cst = arith.constant dense<0.000000e+00> : vector<128xf32>
    %6 = vector.multi_reduction <add>, %3, %cst [0] : vector<2x128xf32> to vector<128xf32>
    %7 = vector.shape_cast %6 : vector<128xf32> to vector<1x128xf32>
    %8 = arith.addf %5, %7 : vector<1x128xf32>
    %c0_6 = arith.constant 0 : index
    %c0_7 = arith.constant 0 : index
    %9 = vector.load %arg4[%c0_6, %c0_7] : memref<40x128xf32, #tpu.memory_space<vmem>>, vector<1x128xf32>
    tpu.vector_store %arg4[%c0_6, %c0_7], %8 {strides = array<i32>} : memref<40x128xf32, #tpu.memory_space<vmem>>, vector<1x128xf32>,
    %c8 = arith.constant 8 : index
    %c0_8 = arith.constant 0 : index
    %10 = vector.load %arg4[%c8, %c0_8] : memref<40x128xf32, #tpu.memory_space<vmem>>, vector<1x128xf32>
    %cst_9 = arith.constant dense<0.000000e+00> : vector<128xf32>
    %11 = vector.multi_reduction <add>, %4, %cst_9 [0] : vector<2x128xf32> to vector<128xf32>
    %12 = vector.shape_cast %11 : vector<128xf32> to vector<1x128xf32>
    %13 = arith.addf %10, %12 : vector<1x128xf32>
    %c8_10 = arith.constant 8 : index
    %c0_11 = arith.constant 0 : index
    %14 = vector.load %arg4[%c8_10, %c0_11] : memref<40x128xf32, #tpu.memory_space<vmem>>, vector<1x128xf32>
    tpu.vector_store %arg4[%c8_10, %c0_11], %13 {strides = array<i32>} : memref<40x128xf32, #tpu.memory_space<vmem>>, vector<1x128xf32>,
    %c16 = arith.constant 16 : index
    %c0_12 = arith.constant 0 : index
    %15 = vector.load %arg4[%c16, %c0_12] : memref<40x128xf32, #tpu.memory_space<vmem>>, vector<1x128xf32>
    %16 = arith.mulf %3, %4 : vector<2x128xf32>
    %cst_13 = arith.constant dense<0.000000e+00> : vector<128xf32>
    %17 = vector.multi_reduction <add>, %16, %cst_13 [0] : vector<2x128xf32> to vector<128xf32>
    %18 = vector.shape_cast %17 : vector<128xf32> to vector<1x128xf32>
    %19 = arith.addf %15, %18 : vector<1x128xf32>
    %c16_14 = arith.constant 16 : index
    %c0_15 = arith.constant 0 : index
    %20 = vector.load %arg4[%c16_14, %c0_15] : memref<40x128xf32, #tpu.memory_space<vmem>>, vector<1x128xf32>
    tpu.vector_store %arg4[%c16_14, %c0_15], %19 {strides = array<i32>} : memref<40x128xf32, #tpu.memory_space<vmem>>, vector<1x128xf32>,
    %c24 = arith.constant 24 : index
    %c0_16 = arith.constant 0 : index
    %21 = vector.load %arg4[%c24, %c0_16] : memref<40x128xf32, #tpu.memory_space<vmem>>, vector<1x128xf32>
    %22 = arith.mulf %3, %3 : vector<2x128xf32>
    %cst_17 = arith.constant dense<0.000000e+00> : vector<128xf32>
    %23 = vector.multi_reduction <add>, %22, %cst_17 [0] : vector<2x128xf32> to vector<128xf32>
    %24 = vector.shape_cast %23 : vector<128xf32> to vector<1x128xf32>
    %25 = arith.addf %21, %24 : vector<1x128xf32>
    %c24_18 = arith.constant 24 : index
    %c0_19 = arith.constant 0 : index
    %26 = vector.load %arg4[%c24_18, %c0_19] : memref<40x128xf32, #tpu.memory_space<vmem>>, vector<1x128xf32>
    tpu.vector_store %arg4[%c24_18, %c0_19], %25 {strides = array<i32>} : memref<40x128xf32, #tpu.memory_space<vmem>>, vector<1x128xf32>,
    %c32 = arith.constant 32 : index
    %c0_20 = arith.constant 0 : index
    %27 = vector.load %arg4[%c32, %c0_20] : memref<40x128xf32, #tpu.memory_space<vmem>>, vector<1x128xf32>
    %28 = arith.mulf %4, %4 : vector<2x128xf32>
    %cst_21 = arith.constant dense<0.000000e+00> : vector<128xf32>
    %29 = vector.multi_reduction <add>, %28, %cst_21 [0] : vector<2x128xf32> to vector<128xf32>
    %30 = vector.shape_cast %29 : vector<128xf32> to vector<1x128xf32>
    %31 = arith.addf %27, %30 : vector<1x128xf32>
    %c32_22 = arith.constant 32 : index
    %c0_23 = arith.constant 0 : index
    %32 = vector.load %arg4[%c32_22, %c0_23] : memref<40x128xf32, #tpu.memory_space<vmem>>, vector<1x128xf32>
    tpu.vector_store %arg4[%c32_22, %c0_23], %31 {strides = array<i32>} : memref<40x128xf32, #tpu.memory_space<vmem>>, vector<1x128xf32>,
    return
  }
  func.func @transform_0(%arg0: i32, %arg1: i32) -> (i32, i32) {
    %c1_i32 = arith.constant 1 : i32
    %0 = arith.muli %arg0, %c1_i32 : i32
    %1 = arith.addi %0, %arg1 : i32
    %c0_i32 = arith.constant 0 : i32
    %c0_i32_0 = arith.constant 0 : i32
    return %1, %c0_i32 : i32, i32
  }
  func.func @transform_1(%arg0: i32, %arg1: i32) -> (i32, i32) {
    %c1_i32 = arith.constant 1 : i32
    %0 = arith.muli %arg0, %c1_i32 : i32
    %1 = arith.addi %0, %arg1 : i32
    %c0_i32 = arith.constant 0 : i32
    %c0_i32_0 = arith.constant 0 : i32
    return %1, %c0_i32 : i32, i32
  }
  func.func @transform_2(%arg0: i32, %arg1: i32) -> (i32, i32) {
    %c0_i32 = arith.constant 0 : i32
    %c0_i32_0 = arith.constant 0 : i32
    return %arg0, %c0_i32 : i32, i32
  }
}

</mosaic_0001>

<bundles_post_ra>
// kernel: ccc_loss.1
= control target key start
LH: loop header
LB: loop body
LE: loop exit
PB: predicated region body
PF: predicated region fallthrough
CT: control target
= control target key end

     0   :  { %vm57_vm0 = vcmask 1041408   ;;  %v127_v0 = vmov 0.0   ;;  %s199_s2 = inlined_call_operand.vmem [shape: f32[40,128], index: 2, kind: output, shape index: {}]   ;;  %s200_s0 = inlined_call_operand.vmem [shape: f32[2,128], index: 0, kind: input, shape index: {}]   ;;  %s201_s1 = inlined_call_operand.vmem [shape: f32[2,128], index: 1, kind: input, shape index: {}]  }
   0x1   :  { %49 = vst [vmem:[%s199_s2] sm:$0xff] %v127_v0  ;;  %50 = vst [vmem:[%s199_s2 + $0x8] sm:$0xff] %v127_v0  ;;  %v54_v1 = vld [vmem:[%s200_s0] sm:$0x3] }
   0x2   :  { %51 = vst [vmem:[%s199_s2 + $0x10] sm:$0xff] %v127_v0  ;;  %52 = vst [vmem:[%s199_s2 + $0x18] sm:$0xff] %v127_v0  ;;  %v55_v2 = vld [vmem:[%s201_s1] sm:$0x3]  ;;  %v58_v3 = vsel %vm57_vm0, %v54_v1, 0.0  ;;  %v89_v6 = vmul.f32 %v54_v1, %v54_v1 }
   0x3   :  { %53 = vst [vmem:[%s199_s2 + $0x20] sm:$0xff] %v127_v0  ;;  %v68_v4 = vsel %vm57_vm0, %v55_v2, 0.0  ;;  %v78_v5 = vmul.f32 %v55_v2, %v54_v1  ;;  %v59_v7 = vrot.slane %v58_v3, 4  ;;  %v100_v9 = vmul.f32 %v55_v2, %v55_v2 }
   0x4   :  { %v69_v8 = vrot.slane %v68_v4, 4  ;;  %v90_v11 = vsel %vm57_vm0, %v89_v6, 0.0 }
   0x5   :  { %v79_v10 = vsel %vm57_vm0, %v78_v5, 0.0  ;;  %v60_v12 = vadd.f32 %v59_v7, %v58_v3  ;;  %v91_v15 = vrot.slane %v90_v11, 4  ;;  %v101_v16 = vsel %vm57_vm0, %v100_v9, 0.0 }
   0x6   :  { %v70_v13 = vadd.f32 %v69_v8, %v68_v4  ;;  %v80_v14 = vrot.slane %v79_v10, 4  ;;  %v102_v25 = vrot.slane %v101_v16, 4 }
   0x7   :  { %v61_v17 = vrot.slane %v60_v12, 2  ;;  %v92_v20 = vadd.f32 %v91_v15, %v90_v11 }
   0x8   :  { %v71_v18 = vrot.slane %v70_v13, 2  ;;  %v81_v19 = vadd.f32 %v80_v14, %v79_v10  ;;  %v56_v30 = vld [vmem:[%s199_s2] sm:$0x1]  ;;  %v67_v31 = vld [vmem:[%s199_s2 + $0x8] sm:$0x1]  ;;  %v103_v32 = vadd.f32 %v102_v25, %v101_v16 }
   0x9   :  { %v62_v21 = vadd.f32 %v61_v17, %v60_v12  ;;  %v93_v24 = vrot.slane %v92_v20, 2  ;;  %v77_v37 = vld [vmem:[%s199_s2 + $0x10] sm:$0x1]  ;;  %v88_v38 = vld [vmem:[%s199_s2 + $0x18] sm:$0x1] }
   0xa   :  { %v72_v22 = vadd.f32 %v71_v18, %v70_v13  ;;  %v82_v23 = vrot.slane %v81_v19, 2  ;;  %v104_v39 = vrot.slane %v103_v32, 2  ;;  %v99_v48 = vld [vmem:[%s199_s2 + $0x20] sm:$0x1] }
   0xb   :  { %v63_v26 = vrot.slane %v62_v21, 1  ;;  %v94_v29 = vadd.f32 %v93_v24, %v92_v20 }
   0xc   :  { %v73_v27 = vrot.slane %v72_v22, 1  ;;  %v83_v28 = vadd.f32 %v82_v23, %v81_v19  ;;  %v105_v44 = vadd.f32 %v104_v39, %v103_v32 }
   0xd   :  { %v64_v33 = vadd.f32 %v63_v26, %v62_v21  ;;  %v95_v36 = vrot.slane %v94_v29, 1 }
   0xe   :  { %v74_v34 = vadd.f32 %v73_v27, %v72_v22  ;;  %v84_v35 = vrot.slane %v83_v28, 1  ;;  %v106_v47 = vrot.slane %v105_v44, 1 }
   0xf   :  { %v65_v40 = vadd.f32 %v64_v33, %v56_v30  ;;  %v96_v43 = vadd.f32 %v95_v36, %v94_v29 }
  0x10   :  { %v75_v41 = vadd.f32 %v74_v34, %v67_v31  ;;  %v85_v42 = vadd.f32 %v84_v35, %v83_v28  ;;  %v107_v49 = vadd.f32 %v106_v47, %v105_v44 }
  0x11   :  { %66 = vst [vmem:[%s199_s2] sm:$0x1] %v65_v40  ;;  %v97_v46 = vadd.f32 %v96_v43, %v88_v38 }
  0x12   :  { %76 = vst [vmem:[%s199_s2 + $0x8] sm:$0x1] %v75_v41  ;;  %v86_v45 = vadd.f32 %v85_v42, %v77_v37  ;;  %v108_v50 = vadd.f32 %v107_v49, %v99_v48 }
  0x13   :  { %98 = vst [vmem:[%s199_s2 + $0x18] sm:$0x1] %v97_v46 }
  0x14   :  { %87 = vst [vmem:[%s199_s2 + $0x10] sm:$0x1] %v86_v45  ;;  %109 = vst [vmem:[%s199_s2 + $0x20] sm:$0x1] %v108_v50 }

</bundles_post_ra>
